<compile_context>
chip_gen: v5e
topology: v5e:2x2
jax: 0.10.0
libtpu: 0.0.40
codegen_flags: <defaults>
</compile_context>

<pallas_src>
import jax
import jax.numpy as jnp
from jax import lax
from jax.experimental import pallas as pl
from jax.experimental.pallas import tpu as pltpu


def _partial_loss_block(sq):
    """Fold a (D, T) f32 squared-error tile into an (8, 128) partial.

    Fast path uses only layout-trivial sublane-group reshapes and whole-vreg
    adds (VALU); fallback does a plain reduce-to-scalar masked into lane (0,0).
    """
    d, t = sq.shape
    if d % 8 == 0 and t % 128 == 0 and (t // 128) <= 64:
        s8 = sq if d == 8 else jnp.sum(sq.reshape(d // 8, 8, t), axis=0)  # (8, T)
        folded = s8[:, 0:128]
        for i in range(1, t // 128):                       # static unroll: vreg adds
            folded = folded + s8[:, 128 * i:128 * (i + 1)]
        return folded.astype(jnp.float32)                  # (8, 128)
    total = jnp.sum(sq.astype(jnp.float32))
    r = lax.broadcasted_iota(jnp.int32, (8, 128), 0)
    c = lax.broadcasted_iota(jnp.int32, (8, 128), 1)
    return jnp.where((r == 0) & (c == 0), total, jnp.float32(0.0))


def _vq_kernel(x_ref, ne_ref, et_ref, e2_ref, q_ref, loss_ref):
    """One (D, TILE_HW) tile of latents for one batch element.

    x_ref:    (1, D, T)      latents tile (D on sublanes, spatial on lanes)
    ne_ref:   (K, D)         -2 * codebook, score dtype (hoisted scale)
    et_ref:   (D, K)         f32 codebook transposed (exact gather operand)
    e2_ref:   (K, 1)         f32 precomputed ||e_k||^2
    q_ref:    (1, D, T)      quantized output tile (lane-dense stores)
    loss_ref: (1, 1, 8, 128) per-tile partial sum of squared (q - x)
    """
    x = x_ref[0]                                    # (D, T)
    ne = ne_ref[...]                                # (K, D)
    et = et_ref[...]                                # (D, K)
    e2 = e2_ref[...]                                # (K, 1) f32

    k = ne.shape[0]
    t = x.shape[1]

    # score[k, n] = ||e_k||^2 - 2 <e_k, x_n>; argmin_k score == nearest code.
    # (-2E is precomputed in the wrapper, so no per-step (K,T) multiply.)
    # TODO(synk): fold e2 into the matmul via an augmented codebook column +
    #             ones row on x to also drop this per-step (K,T) bias add.
    xs = x.astype(ne.dtype)
    score = jnp.dot(ne, xs, preferred_element_type=jnp.float32) + e2      # (K, T)

    # argmin over K (sublane axis) with first-index tie-breaking (torch.argmin).
    min_s = jnp.min(score, axis=0, keepdims=True)                         # (1, T)
    iota_k = lax.broadcasted_iota(jnp.int32, (k, t), 0)                   # (K, T)
    idx = jnp.min(jnp.where(score == min_s, iota_k, k), axis=0,
                  keepdims=True)                                          # (1, T)
    idx = jnp.minimum(idx, k - 1)        # NaN guard: never emit an all-zero one-hot
    one_hot = (iota_k == idx).astype(et.dtype)                            # (K, T)

    # Quantized latents = E^T @ one_hot (codebook gather on the MXU), f32 so the
    # selected rows are the actual codebook values; stores are lane-dense.
    q = jnp.dot(et, one_hot, preferred_element_type=jnp.float32)          # (D, T)
    q_ref[0] = q.astype(q_ref.dtype)

    # Per-tile partial loss (no shared accumulator -> grid axes stay parallel).
    diff = q - x.astype(jnp.float32)
    loss_ref[0, 0] = _partial_loss_block(diff * diff)


def _vmem_budget_bytes():
    """Generation-aware scoped-VMEM budget (leave ~25% headroom)."""
    cap = 64 * 1024 * 1024
    try:
        cap = int(pltpu.get_tpu_info().vmem_capacity_bytes)
    except Exception:
        pass  # unknown chip: assume the smallest (v7x, 64 MiB)
    return (3 * cap) // 4


def _pick_tile_hw(hw, d, k, x_itemsize, score_itemsize, budget):
    """Largest lane-aligned tile of the H*W axis that fits the VMEM budget."""
    code_bytes = k * d * (4 + score_itemsize) + ((k + 7) // 8) * 8 * 128 * 4
    def est(t):
        xq = 2 * 2 * d * t * x_itemsize        # double-buffered x and q tiles
        inter = 4 * k * t * 4                  # live (K, T) f32 temporaries
        return xq + inter + code_bytes
    cands = sorted({hw} | {c for c in range(128, hw, 128) if hw % c == 0})
    fits = [c for c in cands if est(c) <= budget]
    return max(fits) if fits else min(cands)


def vector_quantizer_forward(latents, embedding, beta=0.25, tile_hw=None,
                             score_dtype=None):
    """latents: [B, D, H, W] (NCHW, as in PyTorch).  embedding: [K, D]."""
    B, D, H, W = latents.shape
    K, De = embedding.shape
    assert De == D
    HW = H * W

    # NCHW viewed as (B, D, H*W): no HBM transpose; spatial axis is lane-dense.
    x = latents.reshape(B, D, HW)

    if score_dtype is None:
        score_dtype = latents.dtype       # pass jnp.bfloat16 for v5e throughput
    score_dtype = jnp.dtype(score_dtype)

    # Grid-invariant pieces hoisted out of the kernel body.
    emb_f32 = embedding.astype(jnp.float32)
    neg2e = (-2.0 * emb_f32).astype(score_dtype)                   # (K, D)
    e_t = emb_f32.T                                                # (D, K) f32
    e2 = jnp.sum(emb_f32 * emb_f32, axis=1, keepdims=True)         # (K, 1) f32

    budget = _vmem_budget_bytes()
    if tile_hw is None:
        tile_hw = _pick_tile_hw(HW, D, K, jnp.dtype(latents.dtype).itemsize,
                                score_dtype.itemsize, budget)
    assert HW % tile_hw == 0
    assert tile_hw == HW or tile_hw % 128 == 0, "tiles must be lane-aligned"
    n_t = HW // tile_hw

    def run(single_buffer_codebook):
        cb_kw = {"pipeline_mode": pl.Buffered(1)} if single_buffer_codebook else {}
        grid_spec = pltpu.PrefetchScalarGridSpec(
            num_scalar_prefetch=0,
            grid=(B, n_t),
            in_specs=[
                pl.BlockSpec((1, D, tile_hw), lambda b, t: (b, 0, t)),
                # Codebook blocks: constant index maps -> fetched once.
                pl.BlockSpec((K, D), lambda b, t: (0, 0), **cb_kw),
                pl.BlockSpec((D, K), lambda b, t: (0, 0), **cb_kw),
                pl.BlockSpec((K, 1), lambda b, t: (0, 0), **cb_kw),
            ],
            out_specs=[
                pl.BlockSpec((1, D, tile_hw), lambda b, t: (b, 0, t)),
                pl.BlockSpec((1, 1, 8, 128), lambda b, t: (b, t, 0, 0)),
            ],
        )
        out = pl.pallas_call(
            _vq_kernel,
            out_shape=(
                jax.ShapeDtypeStruct((B, D, HW), latents.dtype),
                jax.ShapeDtypeStruct((B, n_t, 8, 128), jnp.float32),
            ),
            grid_spec=grid_spec,
            compiler_params=pltpu.CompilerParams(
                # No cross-step state -> both axes shard across TensorCores.
                dimension_semantics=("parallel", "parallel"),
                vmem_limit_bytes=budget,
            ),
        )(x, neg2e, e_t, e2)
        return jax.block_until_ready(out)

    try:
        q, loss_parts = run(True)
    except Exception:
        # TODO(synk): pl.Buffered(1) not accepted by this JAX build; fall back
        # to default double-buffered codebook blocks (correctness identical).
        q, loss_parts = run(False)

    # commitment_loss = mse(q.detach(), x); embedding_loss = mse(q, x.detach()).
    # Forward values are identical -> vq_loss = (1 + beta) * mse.
    mse = jnp.sum(loss_parts) / jnp.float32(B * D * HW)
    vq_loss = (1.0 + beta) * mse

    # Straight-through estimator: x + (q - x).detach() == q in the forward pass.
    # TODO(synk): for tiny shapes (demo-sized), batching several B per grid step
    #             would amortize per-step overhead; realistic sizes don't need it.
    return q.reshape(B, D, H, W), vq_loss


def _reference(latents, embedding, beta=0.25):
    """Pure-JAX forward reference matching the PyTorch module."""
    B, D, H, W = latents.shape
    x = jnp.transpose(latents, (0, 2, 3, 1)).reshape(-1, D).astype(jnp.float32)
    e = embedding.astype(jnp.float32)
    # argmin_k(||x||^2 + ||e_k||^2 - 2 x.e_k) == argmin_k(||e_k||^2 - 2 x.e_k).
    score = jnp.sum(e * e, axis=1) - 2.0 * jnp.matmul(
        x, e.T, precision=jax.lax.Precision.HIGHEST)
    idx = jnp.argmin(score, axis=1)
    q = e[idx]
    mse = jnp.mean((q - x) ** 2)
    vq_loss = (1.0 + beta) * mse
    q_nchw = jnp.transpose(q.reshape(B, H, W, D), (0, 3, 1, 2)).astype(latents.dtype)
    return q_nchw, vq_loss


if __name__ == "__main__":
    # Module config (synthetic, deterministic init):
    num_embeddings = 16   # K
    embedding_dim = 8     # D
    beta = 0.25

    key = jax.random.PRNGKey(0)
    k_emb, k_x = jax.random.split(key)

    # nn.Embedding weight ~ U(-1/K, 1/K)
    embedding = jax.random.uniform(
        k_emb, (num_embeddings, embedding_dim), dtype=jnp.float32,
        minval=-1.0 / num_embeddings, maxval=1.0 / num_embeddings)

    # Latents in NCHW, as produced by a conv encoder.
    x = jax.random.normal(k_x, (2, embedding_dim, 16, 16), dtype=jnp.float32)

    q, vq_loss = vector_quantizer_forward(x, embedding, beta=beta)
    q = jax.block_until_ready(q)
    vq_loss = jax.block_until_ready(vq_loss)

    q_ref, vq_loss_ref = _reference(x, embedding, beta=beta)
    assert q.shape == x.shape

    # Robust nearest-code check (immune to fp near-ties in the argmin): every
    # quantized vector must be within epsilon of the true nearest codebook entry.
    D = embedding_dim
    xf = jnp.transpose(x, (0, 2, 3, 1)).reshape(-1, D).astype(jnp.float32)
    qf = jnp.transpose(q, (0, 2, 3, 1)).reshape(-1, D).astype(jnp.float32)
    rf = jnp.transpose(q_ref, (0, 2, 3, 1)).reshape(-1, D).astype(jnp.float32)
    ef = embedding.astype(jnp.float32)
    d_all = (jnp.sum(xf * xf, axis=1, keepdims=True) + jnp.sum(ef * ef, axis=1)
             - 2.0 * jnp.matmul(xf, ef.T, precision=jax.lax.Precision.HIGHEST))
    d_min = jnp.min(d_all, axis=1)
    d_sel = jnp.sum((qf - xf) ** 2, axis=1)
    assert bool(jnp.all(d_sel <= d_min + 1e-4)), "quantized vector is not the nearest code"

    # Elementwise agreement with the reference (can only differ at exact fp ties).
    mismatch_frac = float(jnp.mean(jnp.any(jnp.abs(qf - rf) > 1e-5, axis=1)))
    assert mismatch_frac < 1e-2, f"too many mismatches vs reference: {mismatch_frac}"

    assert jnp.allclose(vq_loss, vq_loss_ref, atol=1e-4), "loss mismatch"

    print("KERNEL_OK")
</pallas_src>

<mosaic_0001>
module attributes {stable_mosaic.version = 11 : i64} {
  func.func @_vq_kernel(%arg0: i32, %arg1: i32, %arg2: memref<1x8x256xf32, #tpu.memory_space<vmem>>, %arg3: memref<16x8xf32, #tpu.memory_space<vmem>>, %arg4: memref<8x16xf32, #tpu.memory_space<vmem>>, %arg5: memref<16x1xf32, #tpu.memory_space<vmem>>, %arg6: memref<1x8x256xf32, #tpu.memory_space<vmem>>, %arg7: memref<1x1x8x128xf32, #tpu.memory_space<vmem>>) attributes {dimension_semantics = [#tpu.dimension_semantics<parallel>, #tpu.dimension_semantics<parallel>], iteration_bounds = array<i64: 2, 1>, scalar_prefetch = 0 : i64, scratch_operands = 0 : i64, tpu.core_type = #tpu.core_type<tc>, window_params = [{transform_indices = @transform_0, window_bounds = array<i64: 1, 8, 256>}, {pipeline_mode = #tpu.pipeline_mode<synchronous>, transform_indices = @transform_1, window_bounds = array<i64: 16, 8>}, {pipeline_mode = #tpu.pipeline_mode<synchronous>, transform_indices = @transform_2, window_bounds = array<i64: 8, 16>}, {pipeline_mode = #tpu.pipeline_mode<synchronous>, transform_indices = @transform_3, window_bounds = array<i64: 16, 1>}, {transform_indices = @transform_4, window_bounds = array<i64: 1, 8, 256>}, {transform_indices = @transform_5, window_bounds = array<i64: 1, 1, 8, 128>}]} {
    %c0 = arith.constant 0 : index
    %c0_0 = arith.constant 0 : index
    %c0_1 = arith.constant 0 : index
    %0 = vector.load %arg2[%c0, %c0_0, %c0_1] : memref<1x8x256xf32, #tpu.memory_space<vmem>>, vector<1x8x256xf32>
    %1 = vector.shape_cast %0 : vector<1x8x256xf32> to vector<8x256xf32>
    %c0_2 = arith.constant 0 : index
    %c0_3 = arith.constant 0 : index
    %2 = vector.load %arg3[%c0_2, %c0_3] : memref<16x8xf32, #tpu.memory_space<vmem>>, vector<16x8xf32>
    %c0_4 = arith.constant 0 : index
    %c0_5 = arith.constant 0 : index
    %3 = vector.load %arg4[%c0_4, %c0_5] : memref<8x16xf32, #tpu.memory_space<vmem>>, vector<8x16xf32>
    %c0_6 = arith.constant 0 : index
    %c0_7 = arith.constant 0 : index
    %4 = vector.load %arg5[%c0_6, %c0_7] : memref<16x1xf32, #tpu.memory_space<vmem>>, vector<16x1xf32>
    %cst = arith.constant dense<0.000000e+00> : vector<16x256xf32>
    %5 = tpu.matmul %2, %1, %cst {dimension_numbers = #tpu.dot_dimension_numbers<[1], [0], [0], [1], [0, 0, 1, 1], [], []>} : vector<16x8xf32>, vector<8x256xf32>, vector<16x256xf32> -> vector<16x256xf32>
    %6 = vector.broadcast %4 : vector<16x1xf32> to vector<16x256xf32>
    %7 = arith.addf %5, %6 : vector<16x256xf32>
    %cst_8 = arith.constant dense<0x7F800000> : vector<256xf32>
    %8 = vector.multi_reduction <minimumf>, %7, %cst_8 [0] : vector<16x256xf32> to vector<256xf32>
    %9 = vector.shape_cast %8 : vector<256xf32> to vector<1x256xf32>
    %10 = tpu.iota {dimensions = array<i32: 0>} : vector<16x256xi32>
    %11 = vector.broadcast %9 : vector<1x256xf32> to vector<16x256xf32>
    %12 = arith.cmpf oeq, %7, %11 : vector<16x256xf32>
    %c16_i32 = arith.constant 16 : i32
    %13 = vector.broadcast %c16_i32 : i32 to vector<16x256xi32>
    %14 = arith.select %12, %10, %13 : vector<16x256xi1>, vector<16x256xi32>
    %cst_9 = arith.constant dense<2147483647> : vector<256xi32>
    %15 = vector.multi_reduction <minsi>, %14, %cst_9 [0] : vector<16x256xi32> to vector<256xi32>
    %16 = vector.shape_cast %15 : vector<256xi32> to vector<1x256xi32>
    %c15_i32 = arith.constant 15 : i32
    %17 = vector.broadcast %c15_i32 : i32 to vector<1x256xi32>
    %18 = arith.minsi %16, %17 : vector<1x256xi32>
    %19 = vector.broadcast %18 : vector<1x256xi32> to vector<16x256xi32>
    %20 = arith.cmpi eq, %10, %19 : vector<16x256xi32>
    %21 = arith.extui %20 : vector<16x256xi1> to vector<16x256xi32>
    %22 = arith.sitofp %21 : vector<16x256xi32> to vector<16x256xf32>
    %cst_10 = arith.constant dense<0.000000e+00> : vector<8x256xf32>
    %23 = tpu.matmul %3, %22, %cst_10 {dimension_numbers = #tpu.dot_dimension_numbers<[1], [0], [0], [1], [0, 0, 1, 1], [], []>} : vector<8x16xf32>, vector<16x256xf32>, vector<8x256xf32> -> vector<8x256xf32>
    %c0_11 = arith.constant 0 : index
    %c0_12 = arith.constant 0 : index
    %c0_13 = arith.constant 0 : index
    %24 = vector.load %arg6[%c0_11, %c0_12, %c0_13] : memref<1x8x256xf32, #tpu.memory_space<vmem>>, vector<1x8x256xf32>
    %25 = vector.shape_cast %24 : vector<1x8x256xf32> to vector<8x256xf32>
    %26 = vector.shape_cast %23 : vector<8x256xf32> to vector<1x8x256xf32>
    tpu.vector_store %arg6[%c0_11, %c0_12, %c0_13], %26 {strides = array<i32>} : memref<1x8x256xf32, #tpu.memory_space<vmem>>, vector<1x8x256xf32>,
    %27 = arith.subf %23, %1 : vector<8x256xf32>
    %28 = arith.mulf %27, %27 : vector<8x256xf32>
    %29 = vector.extract_strided_slice %28 {offsets = [0, 0], sizes = [8, 128], strides = [1, 1]} : vector<8x256xf32> to vector<8x128xf32>
    %30 = vector.extract_strided_slice %28 {offsets = [0, 128], sizes = [8, 128], strides = [1, 1]} : vector<8x256xf32> to vector<8x128xf32>
    %31 = arith.addf %29, %30 : vector<8x128xf32>
    %c0_14 = arith.constant 0 : index
    %c0_15 = arith.constant 0 : index
    %c0_16 = arith.constant 0 : index
    %c0_17 = arith.constant 0 : index
    %32 = vector.load %arg7[%c0_14, %c0_15, %c0_16, %c0_17] : memref<1x1x8x128xf32, #tpu.memory_space<vmem>>, vector<1x1x8x128xf32>
    %33 = vector.shape_cast %32 : vector<1x1x8x128xf32> to vector<8x128xf32>
    %34 = vector.shape_cast %31 : vector<8x128xf32> to vector<1x1x8x128xf32>
    tpu.vector_store %arg7[%c0_14, %c0_15, %c0_16, %c0_17], %34 {strides = array<i32>} : memref<1x1x8x128xf32, #tpu.memory_space<vmem>>, vector<1x1x8x128xf32>,
    return
  }
  func.func @transform_0(%arg0: i32, %arg1: i32) -> (i32, i32, i32) {
    %c0_i32 = arith.constant 0 : i32
    %c0_i32_0 = arith.constant 0 : i32
    return %arg0, %c0_i32, %arg1 : i32, i32, i32
  }
  func.func @transform_1(%arg0: i32, %arg1: i32) -> (i32, i32) {
    %c0_i32 = arith.constant 0 : i32
    %c0_i32_0 = arith.constant 0 : i32
    %c0_i32_1 = arith.constant 0 : i32
    return %c0_i32, %c0_i32_0 : i32, i32
  }
  func.func @transform_2(%arg0: i32, %arg1: i32) -> (i32, i32) {
    %c0_i32 = arith.constant 0 : i32
    %c0_i32_0 = arith.constant 0 : i32
    %c0_i32_1 = arith.constant 0 : i32
    return %c0_i32, %c0_i32_0 : i32, i32
  }
  func.func @transform_3(%arg0: i32, %arg1: i32) -> (i32, i32) {
    %c0_i32 = arith.constant 0 : i32
    %c0_i32_0 = arith.constant 0 : i32
    %c0_i32_1 = arith.constant 0 : i32
    return %c0_i32, %c0_i32_0 : i32, i32
  }
  func.func @transform_4(%arg0: i32, %arg1: i32) -> (i32, i32, i32) {
    %c0_i32 = arith.constant 0 : i32
    %c0_i32_0 = arith.constant 0 : i32
    return %arg0, %c0_i32, %arg1 : i32, i32, i32
  }
  func.func @transform_5(%arg0: i32, %arg1: i32) -> (i32, i32, i32, i32) {
    %c0_i32 = arith.constant 0 : i32
    %c0_i32_0 = arith.constant 0 : i32
    %c0_i32_1 = arith.constant 0 : i32
    return %arg0, %arg1, %c0_i32, %c0_i32_0 : i32, i32, i32, i32
  }
}

module attributes {stable_mosaic.version = 11 : i64} {
  func.func @_vq_kernel(%arg0: i32, %arg1: i32, %arg2: memref<1x8x256xf32, #tpu.memory_space<vmem>>, %arg3: memref<16x8xf32, #tpu.memory_space<vmem>>, %arg4: memref<8x16xf32, #tpu.memory_space<vmem>>, %arg5: memref<16x1xf32, #tpu.memory_space<vmem>>, %arg6: memref<1x8x256xf32, #tpu.memory_space<vmem>>, %arg7: memref<1x1x8x128xf32, #tpu.memory_space<vmem>>) attributes {dimension_semantics = [#tpu.dimension_semantics<parallel>, #tpu.dimension_semantics<parallel>], iteration_bounds = array<i64: 2, 1>, scalar_prefetch = 0 : i64, scratch_operands = 0 : i64, tpu.core_type = #tpu.core_type<tc>, window_params = [{transform_indices = @transform_0, window_bounds = array<i64: 1, 8, 256>}, {pipeline_mode = #tpu.pipeline_mode<synchronous>, transform_indices = @transform_1, window_bounds = array<i64: 16, 8>}, {pipeline_mode = #tpu.pipeline_mode<synchronous>, transform_indices = @transform_2, window_bounds = array<i64: 8, 16>}, {pipeline_mode = #tpu.pipeline_mode<synchronous>, transform_indices = @transform_3, window_bounds = array<i64: 16, 1>}, {transform_indices = @transform_4, window_bounds = array<i64: 1, 8, 256>}, {transform_indices = @transform_5, window_bounds = array<i64: 1, 1, 8, 128>}]} {
    %c0 = arith.constant 0 : index
    %c0_0 = arith.constant 0 : index
    %c0_1 = arith.constant 0 : index
    %0 = vector.load %arg2[%c0, %c0_0, %c0_1] : memref<1x8x256xf32, #tpu.memory_space<vmem>>, vector<1x8x256xf32>
    %1 = vector.shape_cast %0 : vector<1x8x256xf32> to vector<8x256xf32>
    %c0_2 = arith.constant 0 : index
    %c0_3 = arith.constant 0 : index
    %2 = vector.load %arg3[%c0_2, %c0_3] : memref<16x8xf32, #tpu.memory_space<vmem>>, vector<16x8xf32>
    %c0_4 = arith.constant 0 : index
    %c0_5 = arith.constant 0 : index
    %3 = vector.load %arg4[%c0_4, %c0_5] : memref<8x16xf32, #tpu.memory_space<vmem>>, vector<8x16xf32>
    %c0_6 = arith.constant 0 : index
    %c0_7 = arith.constant 0 : index
    %4 = vector.load %arg5[%c0_6, %c0_7] : memref<16x1xf32, #tpu.memory_space<vmem>>, vector<16x1xf32>
    %cst = arith.constant dense<0.000000e+00> : vector<16x256xf32>
    %5 = tpu.matmul %2, %1, %cst {dimension_numbers = #tpu.dot_dimension_numbers<[1], [0], [0], [1], [0, 0, 1, 1], [], []>} : vector<16x8xf32>, vector<8x256xf32>, vector<16x256xf32> -> vector<16x256xf32>
    %6 = vector.broadcast %4 : vector<16x1xf32> to vector<16x256xf32>
    %7 = arith.addf %5, %6 : vector<16x256xf32>
    %cst_8 = arith.constant dense<0x7F800000> : vector<256xf32>
    %8 = vector.multi_reduction <minimumf>, %7, %cst_8 [0] : vector<16x256xf32> to vector<256xf32>
    %9 = vector.shape_cast %8 : vector<256xf32> to vector<1x256xf32>
    %10 = tpu.iota {dimensions = array<i32: 0>} : vector<16x256xi32>
    %11 = vector.broadcast %9 : vector<1x256xf32> to vector<16x256xf32>
    %12 = arith.cmpf oeq, %7, %11 : vector<16x256xf32>
    %c16_i32 = arith.constant 16 : i32
    %13 = vector.broadcast %c16_i32 : i32 to vector<16x256xi32>
    %14 = arith.select %12, %10, %13 : vector<16x256xi1>, vector<16x256xi32>
    %cst_9 = arith.constant dense<2147483647> : vector<256xi32>
    %15 = vector.multi_reduction <minsi>, %14, %cst_9 [0] : vector<16x256xi32> to vector<256xi32>
    %16 = vector.shape_cast %15 : vector<256xi32> to vector<1x256xi32>
    %c15_i32 = arith.constant 15 : i32
    %17 = vector.broadcast %c15_i32 : i32 to vector<1x256xi32>
    %18 = arith.minsi %16, %17 : vector<1x256xi32>
    %19 = vector.broadcast %18 : vector<1x256xi32> to vector<16x256xi32>
    %20 = arith.cmpi eq, %10, %19 : vector<16x256xi32>
    %21 = arith.extui %20 : vector<16x256xi1> to vector<16x256xi32>
    %22 = arith.sitofp %21 : vector<16x256xi32> to vector<16x256xf32>
    %cst_10 = arith.constant dense<0.000000e+00> : vector<8x256xf32>
    %23 = tpu.matmul %3, %22, %cst_10 {dimension_numbers = #tpu.dot_dimension_numbers<[1], [0], [0], [1], [0, 0, 1, 1], [], []>} : vector<8x16xf32>, vector<16x256xf32>, vector<8x256xf32> -> vector<8x256xf32>
    %c0_11 = arith.constant 0 : index
    %c0_12 = arith.constant 0 : index
    %c0_13 = arith.constant 0 : index
    %24 = vector.load %arg6[%c0_11, %c0_12, %c0_13] : memref<1x8x256xf32, #tpu.memory_space<vmem>>, vector<1x8x256xf32>
    %25 = vector.shape_cast %24 : vector<1x8x256xf32> to vector<8x256xf32>
    %26 = vector.shape_cast %23 : vector<8x256xf32> to vector<1x8x256xf32>
    tpu.vector_store %arg6[%c0_11, %c0_12, %c0_13], %26 {strides = array<i32>} : memref<1x8x256xf32, #tpu.memory_space<vmem>>, vector<1x8x256xf32>,
    %27 = arith.subf %23, %1 : vector<8x256xf32>
    %28 = arith.mulf %27, %27 : vector<8x256xf32>
    %29 = vector.extract_strided_slice %28 {offsets = [0, 0], sizes = [8, 128], strides = [1, 1]} : vector<8x256xf32> to vector<8x128xf32>
    %30 = vector.extract_strided_slice %28 {offsets = [0, 128], sizes = [8, 128], strides = [1, 1]} : vector<8x256xf32> to vector<8x128xf32>
    %31 = arith.addf %29, %30 : vector<8x128xf32>
    %c0_14 = arith.constant 0 : index
    %c0_15 = arith.constant 0 : index
    %c0_16 = arith.constant 0 : index
    %c0_17 = arith.constant 0 : index
    %32 = vector.load %arg7[%c0_14, %c0_15, %c0_16, %c0_17] : memref<1x1x8x128xf32, #tpu.memory_space<vmem>>, vector<1x1x8x128xf32>
    %33 = vector.shape_cast %32 : vector<1x1x8x128xf32> to vector<8x128xf32>
    %34 = vector.shape_cast %31 : vector<8x128xf32> to vector<1x1x8x128xf32>
    tpu.vector_store %arg7[%c0_14, %c0_15, %c0_16, %c0_17], %34 {strides = array<i32>} : memref<1x1x8x128xf32, #tpu.memory_space<vmem>>, vector<1x1x8x128xf32>,
    return
  }
  func.func @transform_0(%arg0: i32, %arg1: i32) -> (i32, i32, i32) {
    %c0_i32 = arith.constant 0 : i32
    %c0_i32_0 = arith.constant 0 : i32
    return %arg0, %c0_i32, %arg1 : i32, i32, i32
  }
  func.func @transform_1(%arg0: i32, %arg1: i32) -> (i32, i32) {
    %c0_i32 = arith.constant 0 : i32
    %c0_i32_0 = arith.constant 0 : i32
    %c0_i32_1 = arith.constant 0 : i32
    return %c0_i32, %c0_i32_0 : i32, i32
  }
  func.func @transform_2(%arg0: i32, %arg1: i32) -> (i32, i32) {
    %c0_i32 = arith.constant 0 : i32
    %c0_i32_0 = arith.constant 0 : i32
    %c0_i32_1 = arith.constant 0 : i32
    return %c0_i32, %c0_i32_0 : i32, i32
  }
  func.func @transform_3(%arg0: i32, %arg1: i32) -> (i32, i32) {
    %c0_i32 = arith.constant 0 : i32
    %c0_i32_0 = arith.constant 0 : i32
    %c0_i32_1 = arith.constant 0 : i32
    return %c0_i32, %c0_i32_0 : i32, i32
  }
  func.func @transform_4(%arg0: i32, %arg1: i32) -> (i32, i32, i32) {
    %c0_i32 = arith.constant 0 : i32
    %c0_i32_0 = arith.constant 0 : i32
    return %arg0, %c0_i32, %arg1 : i32, i32, i32
  }
  func.func @transform_5(%arg0: i32, %arg1: i32) -> (i32, i32, i32, i32) {
    %c0_i32 = arith.constant 0 : i32
    %c0_i32_0 = arith.constant 0 : i32
    %c0_i32_1 = arith.constant 0 : i32
    return %arg0, %arg1, %c0_i32, %c0_i32_0 : i32, i32, i32, i32
  }
}

</mosaic_0001>

<bundles_post_ra>
// kernel: tpu_custom_call.1
= control target key start
LH: loop header
LB: loop body
LE: loop exit
PB: predicated region body
PF: predicated region fallthrough
CT: control target
= control target key end

     0   :  { %s983_s0 = inlined_call_operand.vmem [shape: f32[2,8,256], index: 0, kind: input, shape index: {}]   ;;  %s984_s1 = inlined_call_operand.vmem [shape: f32[16,8], index: 1, kind: input, shape index: {}]   ;;  %s985_s2 = inlined_call_operand.vmem [shape: f32[8,16], index: 2, kind: input, shape index: {}]   ;;  %s986_s3 = inlined_call_operand.vmem [shape: f32[16,1], index: 3, kind: input, shape index: {}]   ;;  %s987_s4 = inlined_call_operand.hbm [shape: f32[2,8,256], index: 4, kind: output, shape index: {0}]   ;;  %s988_s5 = inlined_call_operand.hbm [shape: f32[2,1,8,128], index: 5, kind: output, shape index: {1}]  }
   0x1   :  { %989 = sst [smem:[#allocation8_spill]] %s983_s0 }
   0x2   :  { %11 = vsyncpa [#allocation3], 0 }
   0x3   :  { %13 = vsyncpa [#allocation3 + $0x1], 0 }
   0x4   :  { %14 = vsyncpa [#allocation5], 0 }
   0x5   :  { %16 = vsyncpa [#allocation5 + $0x1], 0  ;;  %s840_s18 = smov 0   ;;  %s842_s19 = smov 0  }
   0x6   :  { %s844_s20 = smov 0   ;;  %s846_s21 = smov 0  }
   0x7   :  { %s848_s22 = smov 0   ;;  %s850_s23 = smov 0  }
   0x8 LB: > { %s601_s24 = sadd.s32 4294967295, %s806_s23   ;;  %s602_s25 = sadd.s32 4294967294, %s806_s23   ;;  %s806_s23 = sphi %s850_s23, %s22_s23   ;;  %s802_s22 = sphi %s848_s22, %s997_s22   ;;  %s798_s21 = sphi %s846_s21, %s996_s21   ;;  %s794_s20 = sphi %s844_s20, %s995_s20   ;;  %s790_s19 = sphi %s842_s19, %s994_s19   ;;  %s786_s18 = sphi %s840_s18, %s993_s18  }
   0x9   : > { %s34_s26 = sadd.s32 1, %s802_s22  ;;  %s134_s27 = sadd.s32 1, %s794_s20 }
   0xa   : > { %p36_p0 = scmp.ge.s32.totalorder %s34_s26, 2  ;;  %p144_p1 = scmp.ne.s32.totalorder %s794_s20, %s790_s19 }
   0xb   : > { %p145_p2 = scmp.eq.s32.totalorder %s601_s24, 1  ;;  %p150_p3 = scmp.ne.s32.totalorder %s790_s19, %s786_s18 }
   0xc   : > { %s999_s26 = smov (%p36_p0, %s34_s26), 0  ;;  %p151_p5 = scmp.eq.s32.totalorder %s602_s25, 1 }
   0xd   : > { %p880_p4 = por %p145_p2, %p144_p1  ;;  %s129_s29 = ssub.s32 %s802_s22, %s999_s26 }
   0xe   : > { %p605_p6 = scmp.ge.s32.totalorder %s806_s23, 1  ;;  %p132_p7 = scmp.eq.s32.totalorder %s129_s29, 0 }
   0xf   : > { %p887_p8 = por %p151_p5, %p150_p3  ;;  %p219_p9 = scmp.lt.s32.totalorder %s806_s23, 3 }
  0x10   : > { %s893_s6 = scalar_select %p132_p7, %s794_s20, %s134_s27  }
  0x11   : > { %p220_p10 = pnand %p605_p6, %p219_p9 }
  0x12   : > { %p257_p11 = scmp.lt.s32.totalorder (!%p220_p10), %s798_s21, 1  ;;  %s992_s0 = sld [smem:[#allocation8_spill]] (!%p220_p10) }
  0x13   : > { %223 = sbr.rel (%p220_p10) target bundleno = 351 (0x15f), region = 36  ;;  %s922_s7 = sand.u32 (!%p220_p10), 1, %s790_s19  }
  0x14   : > { %s606_s8 = sshll.u32 (!%p220_p10), %s922_s7, 4  ;;  %s607_s15 = sshll.u32 (!%p220_p10), %s922_s7, 3 }
  0x15   : > { %s628_s16 = sshll.u32 (!%p220_p10), %s798_s21, 3  ;;  %s716_s24 = scalar_lea.hbm (!%p220_p10), %s987_s4, 32 }
  0x16   : > { %s934_s27 = scalar_lea.hbm (!%p220_p10), %s988_s5, %s628_s16 }
  0x18   : > { %v272_v0 = vld [vmem:[%s986_s3] sm:$0xff]  ;;  %v808_v1 = vmov 0   ;;  %s258_s9 = scalar_select %p257_p11, %s798_s21, 1  ;;  %vm284_vm0 = vcmask 64512   ;;  %v273_v5 = vld [vmem:[%s986_s3 + $0x8] sm:$0xff]  ;;  %v351_v21 = vlaneseq  ;;  %v809_v54 = vmov 1.0  }
  0x19   : > { %695 = vset.pattern.permute.xlu0 %v808_v1  ;;  %v269_v2 = vld [vmem:[%s984_s1] sm:$0xff]  ;;  %v270_v6 = vld [vmem:[%s984_s1 + $0x8] sm:$0xff] }
  0x1a   : > { %276 = vperm.xlu0 %695, %v272_v0   ;;  %s631_s10 = sshll.u32 %s258_s9, 4  ;;  %v352_v26 = vshrl.u32 %v351_v21, 7  ;;  %v271_v55 = vld [vmem:[%s985_s2] sm:$0xff]  ;;  %s632_s9 = sshll.u32 %s798_s21, 4 }
  0x1b   : > { %s264_s13 = scalar_lea.vmem %s992_s0, %s631_s10  ;;  %s471_s12 = scalar_lea.hbm %s987_s4, %s632_s9 }
  0x1c   : > { %v906_v3 = vld [vmem:[%s264_s13] sm:$0xff]  ;;  %v908_v4 = vld [vmem:[%s264_s13 + $0x8] sm:$0xff]  ;;  %v353_v31 = vadd.s32 8, %v352_v26  ;;  %s248_s13 = scalar_lea.vmem [#allocation2], %s606_s8  ;;  %s475_s17 = sshll.u32 %s471_s12, 4  ;;  %s476_s17 = int_to_ptr.hbm [resolvable:$true] %s475_s17 }
  0x1d   : > { %306 = vmatpush.msra.mxu0 %v906_v3  ;;  %329 = vmatpush.msra.mxu1 %v908_v4  ;;  %s473_s14 = sshll.u32 %s248_s13, 4  ;;  %s255_s21 = scalar_lea.vmem [#allocation4], %s607_s15  ;;  %s474_s14 = int_to_ptr.vmem [resolvable:$true] %s473_s14 }
  0x1e   : > { %610 = vmatmul.msk.f32.vlgmr.msra.gmra.mxu0 %vm284_vm0, %v269_v2  ;;  %612 = vmatmul.msk.f32.vlgmr.msra.gmra.mxu1 %vm284_vm0, %v269_v2  ;;  %s488_s29 = sshll.u32 %s255_s21, 4  ;;  %s490_s8 = sshll.u32 %s934_s27, 4  ;;  %s489_s29 = int_to_ptr.vmem [resolvable:$true] %s488_s29  ;;  %s491_s8 = int_to_ptr.hbm [resolvable:$true] %s490_s8 }
  0x1f   : > { %s453_s9 = scalar_lea.sflag [#allocation3], %s922_s7  ;;  %s710_s10 = sshra.s32 %s476_s17, 4  ;;  %s711_s10 = int_to_ptr.hbm [resolvable:$true] %s710_s10 }
  0x20   : > { %s712_s11 = scalar_lea.hbm %s711_s10, 16  ;;  %p717_p1 = scmp.lt.s32.totalorder %s711_s10, %s987_s4 }
  0x21   : > { %p713_p12 = scmp.ne.s32.totalorder %s711_s10, %s712_s11  ;;  %p718_p2 = scmp.lt.s32.totalorder %s716_s24, %s712_s11 }
  0x22   : > { %281 = vperm.xlu0 %695, %v273_v5  }
  0x23   : > { %p714_p13 = pnand %p713_p12, %p880_p4  ;;  %p719_p3 = por %p718_p2, %p717_p1 }
  0x25   : > { %p715_p0 = pneg %p714_p13 }
  0x26   : > { %611 = vmatmul.msk.f32.gmra.mxu0 %vm284_vm0, %v270_v6  ;;  %613 = vmatmul.msk.f32.gmra.mxu1 %vm284_vm0, %v270_v6 }
  0x27   : > { %p720_p5 = pnand %p719_p3, %p715_p0 }
  0x8c   : > { %v277_v7 = vpop.permute.xlu0 %276 }
  0x94   : > { %v282_v10 = vpop.permute.xlu0 %281 }
  0x9b   : > { %v308_v8 = vpop.f32.mrf.mxu0  ;;  %v331_v9 = vpop.f32.mrf.mxu1 }
  0x9c   : > { %v309_v13 = vadd.f32 %v308_v8, %v277_v7  ;;  %v332_v14 = vadd.f32 %v331_v9, %v277_v7 }
  0xa3   : > { %v311_v11 = vpop.f32.mrf.mxu0  ;;  %v334_v12 = vpop.f32.mrf.mxu1 }
  0xa4   : > { %v312_v15 = vadd.f32 %v311_v11, %v282_v10  ;;  %v335_v16 = vadd.f32 %v334_v12, %v282_v10 }
  0xa6   : > { %v337_v17 = vmin.f32 %v309_v13, %v312_v15  ;;  %v344_v18 = vmin.f32 %v332_v14, %v335_v16 }
  0xa8   : > { %v338_v19 = vrot.slane %v337_v17, 4  ;;  %v345_v20 = vrot.slane %v344_v18, 4 }
  0xaa   : > { %v339_v22 = vmin.f32 %v337_v17, %v338_v19  ;;  %v346_v23 = vmin.f32 %v344_v18, %v345_v20 }
  0xac   : > { %v340_v24 = vrot.slane %v339_v22, 2  ;;  %v347_v25 = vrot.slane %v346_v23, 2 }
  0xae   : > { %v341_v27 = vmin.f32 %v339_v22, %v340_v24  ;;  %v348_v28 = vmin.f32 %v346_v23, %v347_v25 }
  0xb0   : > { %v342_v29 = vrot.slane %v341_v27, 1  ;;  %v349_v30 = vrot.slane %v348_v28, 1 }
  0xb2   : > { %v343_v32 = vmin.f32 %v341_v27, %v342_v29  ;;  %v350_v33 = vmin.f32 %v348_v28, %v349_v30 }
  0xb4   : > { %vm354_vm1 = vcmp.eq.f32.partialorder %v309_v13, %v343_v32  ;;  %vm356_vm2 = vcmp.eq.f32.partialorder %v312_v15, %v343_v32  ;;  %vm355_vm3 = vcmp.eq.f32.partialorder %v332_v14, %v350_v33  ;;  %vm357_vm4 = vcmp.eq.f32.partialorder %v335_v16, %v350_v33 }
  0xb5   : > { %v358_v34 = vsel %vm354_vm1, %v352_v26, 16  ;;  %v360_v35 = vsel %vm356_vm2, %v353_v31, 16  ;;  %v359_v36 = vsel %vm355_vm3, %v352_v26, 16  ;;  %v361_v37 = vsel %vm357_vm4, %v353_v31, 16 }
  0xb6   : > { %vm362_vm5 = vcmp.lt.s32.totalorder %v358_v34, %v360_v35  ;;  %vm373_vm6 = vcmp.lt.s32.totalorder %v359_v36, %v361_v37  ;;  %vm400_vm1 = vcmask 130048  }
  0xb7   : > { %v363_v38 = vsel %vm362_vm5, %v358_v34, %v360_v35  ;;  %v374_v39 = vsel %vm373_vm6, %v359_v36, %v361_v37 }
  0xb8   : > { %v364_v40 = vrot.slane %v363_v38, 4  ;;  %v375_v41 = vrot.slane %v374_v39, 4 }
  0xba   : > { %vm365_vm7 = vcmp.lt.s32.totalorder %v363_v38, %v364_v40  ;;  %vm376_vm8 = vcmp.lt.s32.totalorder %v374_v39, %v375_v41 }
  0xbb   : > { %v366_v42 = vsel %vm365_vm7, %v363_v38, %v364_v40  ;;  %v377_v43 = vsel %vm376_vm8, %v374_v39, %v375_v41 }
  0xbc   : > { %v367_v44 = vrot.slane %v366_v42, 2  ;;  %v378_v45 = vrot.slane %v377_v43, 2 }
  0xbe   : > { %vm368_vm9 = vcmp.lt.s32.totalorder %v366_v42, %v367_v44  ;;  %vm379_vm10 = vcmp.lt.s32.totalorder %v377_v43, %v378_v45 }
  0xbf   : > { %v369_v46 = vsel %vm368_vm9, %v366_v42, %v367_v44  ;;  %v380_v47 = vsel %vm379_vm10, %v377_v43, %v378_v45 }
  0xc0   : > { %v370_v48 = vrot.slane %v369_v46, 1  ;;  %v381_v49 = vrot.slane %v380_v47, 1 }
  0xc2   : > { %vm371_vm11 = vcmp.lt.s32.totalorder %v369_v46, %v370_v48  ;;  %vm382_vm12 = vcmp.lt.s32.totalorder %v380_v47, %v381_v49 }
  0xc3   : > { %v372_v50 = vsel %vm371_vm11, %v369_v46, %v370_v48  ;;  %v383_v51 = vsel %vm382_vm12, %v380_v47, %v381_v49 }
  0xc4   : > { %vm384_vm13 = vcmp.lt.s32.totalorder %v372_v50, 15  ;;  %vm386_vm14 = vcmp.lt.s32.totalorder %v383_v51, 15 }
  0xc5   : > { %v385_v52 = vsel %vm384_vm13, %v372_v50, 15  ;;  %v387_v53 = vsel %vm386_vm14, %v383_v51, 15 }
  0xc6   : > { %vm390_vm15 = vcmp.eq.s32.totalorder %v353_v31, %v385_v52  ;;  %vm391_vm0 = vcmp.eq.s32.totalorder %v353_v31, %v387_v53  ;;  %vm388_vm2 = vcmp.eq.s32.totalorder %v352_v26, %v385_v52  ;;  %vm389_vm3 = vcmp.eq.s32.totalorder %v352_v26, %v387_v53 }
  0xc7   : > { %618 = vmatpush.msk.msra.mxu2 %vm390_vm15, %v809_v54  ;;  %621 = vmatpush.msk.msra.mxu3 %vm391_vm0, %v809_v54 }
  0xc9   : > { %619 = vmatpush.msk.msra.mxu2 %vm388_vm2, %v809_v54  ;;  %622 = vmatpush.msk.msra.mxu3 %vm389_vm3, %v809_v54 }
  0xca   : > { %620 = vmatmul.msk.f32.vlgmr.msra.gmra.mxu2 %vm400_vm1, %v271_v55  ;;  %623 = vmatmul.msk.f32.vlgmr.msra.gmra.mxu3 %vm400_vm1, %v271_v55 }
 0x14d   : > { %v421_v56 = vpop.f32.mrf.mxu2  ;;  %v441_v57 = vpop.f32.mrf.mxu3 }
 0x14e   : > { %444 = vst [vmem:[%s248_s13] sm:$0xff] %v421_v56  ;;  %v446_v58 = vsub.f32 %v421_v56, %v906_v3  ;;  %v447_v59 = vsub.f32 %v441_v57, %v908_v4 }
 0x14f   : > { %445 = vst [vmem:[%s248_s13 + $0x8] sm:$0xff] %v441_v57 }
 0x150   : > { %v448_v60 = vmul.f32 %v446_v58, %v446_v58  ;;  %v449_v61 = vmul.f32 %v447_v59, %v447_v59 }
 0x151   : > { %723 = shalt.err (!%p720_p5)
}
 0x152   : > { %633 = dma.vmem_to_hbm [thread:$0]  (%p880_p4), %s474_s14, 256, %s476_s17, %s453_s9   ;;  %v450_v62 = vadd.f32 %v449_v61, %v448_v60 }
 0x153   : > { %s458_s13 = scalar_lea.sflag [#allocation5], %s922_s7  ;;  %s738_s15 = sshra.s32 %s491_s8, 4  ;;  %s739_s15 = int_to_ptr.hbm [resolvable:$true] %s738_s15 }
 0x154   : > { %451 = vst [vmem:[%s255_s21] sm:$0xff] %v450_v62  ;;  %s740_s27 = scalar_lea.hbm %s739_s15, 8  ;;  %s744_s11 = scalar_lea.hbm %s988_s5, 16 }
 0x155   : > { %p741_p6 = scmp.ne.s32.totalorder %s739_s15, %s740_s27  ;;  %p745_p10 = scmp.lt.s32.totalorder %s739_s15, %s988_s5 }
 0x156   : > { %p746_p11 = scmp.lt.s32.totalorder %s744_s11, %s740_s27 }
 0x157   : > { %p742_p7 = pnand %p741_p6, %p880_p4 }
 0x158   : > { %p747_p12 = por %p746_p11, %p745_p10 }
 0x159   : > { %p743_p9 = pneg %p742_p7 }
 0x15b   : > { %p748_p13 = pnand %p747_p12, %p743_p9 }
 0x15d   : > { %751 = shalt.err (!%p748_p13)
}
 0x15e   : > { %634 = dma.vmem_to_hbm [thread:$0]  (%p880_p4), %s489_s29, 128, %s491_s8, %s458_s13  }
 0x15f PF: > { %p644_p0 = scmp.ge.s32.totalorder %s806_s23, 2  ;;  %s502_s7 = sand.u32 1, %s786_s18  }
 0x160   : > { %s503_s14 = scalar_lea.sflag [#allocation3], %s502_s7 }
 0x161   : > { %p638_p1 = pnand %p644_p0, %p887_p8 }
 0x163   : > { %p639_p2 = pneg %p638_p1 }
 0x165   : > { %777 = dma.done.wait (%p639_p2), %s503_s14, 256  }
 0x166   : > { %779 = vsyncadd (%p639_p2), %s503_s14, 4294967040  ;;  %s513_s17 = scalar_lea.sflag [#allocation5], %s502_s7 }
 0x167   : > { %781 = dma.done.wait (%p639_p2), %s513_s17, 128  }
 0x168   : > { %783 = vsyncadd (%p639_p2), %s513_s17, 4294967168  ;;  %s22_s23 = sadd.s32 1, %s806_s23   ;;  %s993_s18 = smov %s790_s19 }
 0x169   : > { %p19_p3 = scmp.ge.s32.totalorder %s22_s23, 4   ;;  %s994_s19 = smov %s794_s20 }
 0x16a   : > { %s995_s20 = smov %s893_s6  ;;  %s996_s21 = smov %s802_s22 }
 0x16b   : > { %s997_s22 = smov %s999_s26  ;;  %21 = sbr.rel (!%p19_p3) target bundleno = 8 (0x8), region = 88 }
 0x170   :  { %519 = vsyncpa [#allocation3], 1 }
 0x171   :  { %521 = vsyncpa [#allocation3 + $0x1], 1 }
 0x172   :  { %522 = vsyncpa [#allocation5], 1 }
 0x173   :  { %524 = vsyncpa [#allocation5 + $0x1], 1 }

// kernel: tpu_custom_call.1
= control target key start
LH: loop header
LB: loop body
LE: loop exit
PB: predicated region body
PF: predicated region fallthrough
CT: control target
= control target key end

     0   :  { %s983_s0 = inlined_call_operand.vmem [shape: f32[2,8,256], index: 0, kind: input, shape index: {}]   ;;  %s984_s1 = inlined_call_operand.vmem [shape: f32[16,8], index: 1, kind: input, shape index: {}]   ;;  %s985_s2 = inlined_call_operand.vmem [shape: f32[8,16], index: 2, kind: input, shape index: {}]   ;;  %s986_s3 = inlined_call_operand.vmem [shape: f32[16,1], index: 3, kind: input, shape index: {}]   ;;  %s987_s4 = inlined_call_operand.hbm [shape: f32[2,8,256], index: 4, kind: output, shape index: {0}]   ;;  %s988_s5 = inlined_call_operand.hbm [shape: f32[2,1,8,128], index: 5, kind: output, shape index: {1}]  }
   0x1   :  { %989 = sst [smem:[#allocation8_spill]] %s983_s0 }
   0x2   :  { %11 = vsyncpa [#allocation3], 0 }
   0x3   :  { %13 = vsyncpa [#allocation3 + $0x1], 0 }
   0x4   :  { %14 = vsyncpa [#allocation5], 0 }
   0x5   :  { %16 = vsyncpa [#allocation5 + $0x1], 0  ;;  %s840_s18 = smov 0   ;;  %s842_s19 = smov 0  }
   0x6   :  { %s844_s20 = smov 0   ;;  %s846_s21 = smov 0  }
   0x7   :  { %s848_s22 = smov 0   ;;  %s850_s23 = smov 0  }
   0x8 LB: > { %s601_s24 = sadd.s32 4294967295, %s806_s23   ;;  %s602_s25 = sadd.s32 4294967294, %s806_s23   ;;  %s806_s23 = sphi %s850_s23, %s22_s23   ;;  %s802_s22 = sphi %s848_s22, %s997_s22   ;;  %s798_s21 = sphi %s846_s21, %s996_s21   ;;  %s794_s20 = sphi %s844_s20, %s995_s20   ;;  %s790_s19 = sphi %s842_s19, %s994_s19   ;;  %s786_s18 = sphi %s840_s18, %s993_s18  }
   0x9   : > { %s34_s26 = sadd.s32 1, %s802_s22  ;;  %s134_s27 = sadd.s32 1, %s794_s20 }
   0xa   : > { %p36_p0 = scmp.ge.s32.totalorder %s34_s26, 2  ;;  %p144_p1 = scmp.ne.s32.totalorder %s794_s20, %s790_s19 }
   0xb   : > { %p145_p2 = scmp.eq.s32.totalorder %s601_s24, 1  ;;  %p150_p3 = scmp.ne.s32.totalorder %s790_s19, %s786_s18 }
   0xc   : > { %s999_s26 = smov (%p36_p0, %s34_s26), 0  ;;  %p151_p5 = scmp.eq.s32.totalorder %s602_s25, 1 }
   0xd   : > { %p880_p4 = por %p145_p2, %p144_p1  ;;  %s129_s29 = ssub.s32 %s802_s22, %s999_s26 }
   0xe   : > { %p605_p6 = scmp.ge.s32.totalorder %s806_s23, 1  ;;  %p132_p7 = scmp.eq.s32.totalorder %s129_s29, 0 }
   0xf   : > { %p887_p8 = por %p151_p5, %p150_p3  ;;  %p219_p9 = scmp.lt.s32.totalorder %s806_s23, 3 }
  0x10   : > { %s893_s6 = scalar_select %p132_p7, %s794_s20, %s134_s27  }
  0x11   : > { %p220_p10 = pnand %p605_p6, %p219_p9 }
  0x12   : > { %p257_p11 = scmp.lt.s32.totalorder (!%p220_p10), %s798_s21, 1  ;;  %s992_s0 = sld [smem:[#allocation8_spill]] (!%p220_p10) }
  0x13   : > { %223 = sbr.rel (%p220_p10) target bundleno = 351 (0x15f), region = 36  ;;  %s922_s7 = sand.u32 (!%p220_p10), 1, %s790_s19  }
  0x14   : > { %s606_s8 = sshll.u32 (!%p220_p10), %s922_s7, 4  ;;  %s607_s15 = sshll.u32 (!%p220_p10), %s922_s7, 3 }
  0x15   : > { %s628_s16 = sshll.u32 (!%p220_p10), %s798_s21, 3  ;;  %s716_s24 = scalar_lea.hbm (!%p220_p10), %s987_s4, 32 }
  0x16   : > { %s934_s27 = scalar_lea.hbm (!%p220_p10), %s988_s5, %s628_s16 }
  0x18   : > { %v272_v0 = vld [vmem:[%s986_s3] sm:$0xff]  ;;  %v808_v1 = vmov 0   ;;  %s258_s9 = scalar_select %p257_p11, %s798_s21, 1  ;;  %vm284_vm0 = vcmask 64512   ;;  %v273_v5 = vld [vmem:[%s986_s3 + $0x8] sm:$0xff]  ;;  %v351_v21 = vlaneseq  ;;  %v809_v54 = vmov 1.0  }
  0x19   : > { %695 = vset.pattern.permute.xlu0 %v808_v1  ;;  %v269_v2 = vld [vmem:[%s984_s1] sm:$0xff]  ;;  %v270_v6 = vld [vmem:[%s984_s1 + $0x8] sm:$0xff] }
  0x1a   : > { %276 = vperm.xlu0 %695, %v272_v0   ;;  %s631_s10 = sshll.u32 %s258_s9, 4  ;;  %v352_v26 = vshrl.u32 %v351_v21, 7  ;;  %v271_v55 = vld [vmem:[%s985_s2] sm:$0xff]  ;;  %s632_s9 = sshll.u32 %s798_s21, 4 }
  0x1b   : > { %s264_s13 = scalar_lea.vmem %s992_s0, %s631_s10  ;;  %s471_s12 = scalar_lea.hbm %s987_s4, %s632_s9 }
  0x1c   : > { %v906_v3 = vld [vmem:[%s264_s13] sm:$0xff]  ;;  %v908_v4 = vld [vmem:[%s264_s13 + $0x8] sm:$0xff]  ;;  %v353_v31 = vadd.s32 8, %v352_v26  ;;  %s248_s13 = scalar_lea.vmem [#allocation2], %s606_s8  ;;  %s475_s17 = sshll.u32 %s471_s12, 4  ;;  %s476_s17 = int_to_ptr.hbm [resolvable:$true] %s475_s17 }
  0x1d   : > { %306 = vmatpush.msra.mxu0 %v906_v3  ;;  %329 = vmatpush.msra.mxu1 %v908_v4  ;;  %s473_s14 = sshll.u32 %s248_s13, 4  ;;  %s255_s21 = scalar_lea.vmem [#allocation4], %s607_s15  ;;  %s474_s14 = int_to_ptr.vmem [resolvable:$true] %s473_s14 }
  0x1e   : > { %610 = vmatmul.msk.f32.vlgmr.msra.gmra.mxu0 %vm284_vm0, %v269_v2  ;;  %612 = vmatmul.msk.f32.vlgmr.msra.gmra.mxu1 %vm284_vm0, %v269_v2  ;;  %s488_s29 = sshll.u32 %s255_s21, 4  ;;  %s490_s8 = sshll.u32 %s934_s27, 4  ;;  %s489_s29 = int_to_ptr.vmem [resolvable:$true] %s488_s29  ;;  %s491_s8 = int_to_ptr.hbm [resolvable:$true] %s490_s8 }
  0x1f   : > { %s453_s9 = scalar_lea.sflag [#allocation3], %s922_s7  ;;  %s710_s10 = sshra.s32 %s476_s17, 4  ;;  %s711_s10 = int_to_ptr.hbm [resolvable:$true] %s710_s10 }
  0x20   : > { %s712_s11 = scalar_lea.hbm %s711_s10, 16  ;;  %p717_p1 = scmp.lt.s32.totalorder %s711_s10, %s987_s4 }
  0x21   : > { %p713_p12 = scmp.ne.s32.totalorder %s711_s10, %s712_s11  ;;  %p718_p2 = scmp.lt.s32.totalorder %s716_s24, %s712_s11 }
  0x22   : > { %281 = vperm.xlu0 %695, %v273_v5  }
  0x23   : > { %p714_p13 = pnand %p713_p12, %p880_p4  ;;  %p719_p3 = por %p718_p2, %p717_p1 }
  0x25   : > { %p715_p0 = pneg %p714_p13 }
  0x26   : > { %611 = vmatmul.msk.f32.gmra.mxu0 %vm284_vm0, %v270_v6  ;;  %613 = vmatmul.msk.f32.gmra.mxu1 %vm284_vm0, %v270_v6 }
  0x27   : > { %p720_p5 = pnand %p719_p3, %p715_p0 }
  0x8c   : > { %v277_v7 = vpop.permute.xlu0 %276 }
  0x94   : > { %v282_v10 = vpop.permute.xlu0 %281 }
  0x9b   : > { %v308_v8 = vpop.f32.mrf.mxu0  ;;  %v331_v9 = vpop.f32.mrf.mxu1 }
  0x9c   : > { %v309_v13 = vadd.f32 %v308_v8, %v277_v7  ;;  %v332_v14 = vadd.f32 %v331_v9, %v277_v7 }
  0xa3   : > { %v311_v11 = vpop.f32.mrf.mxu0  ;;  %v334_v12 = vpop.f32.mrf.mxu1 }
  0xa4   : > { %v312_v15 = vadd.f32 %v311_v11, %v282_v10  ;;  %v335_v16 = vadd.f32 %v334_v12, %v282_v10 }
  0xa6   : > { %v337_v17 = vmin.f32 %v309_v13, %v312_v15  ;;  %v344_v18 = vmin.f32 %v332_v14, %v335_v16 }
  0xa8   : > { %v338_v19 = vrot.slane %v337_v17, 4  ;;  %v345_v20 = vrot.slane %v344_v18, 4 }
  0xaa   : > { %v339_v22 = vmin.f32 %v337_v17, %v338_v19  ;;  %v346_v23 = vmin.f32 %v344_v18, %v345_v20 }
  0xac   : > { %v340_v24 = vrot.slane %v339_v22, 2  ;;  %v347_v25 = vrot.slane %v346_v23, 2 }
  0xae   : > { %v341_v27 = vmin.f32 %v339_v22, %v340_v24  ;;  %v348_v28 = vmin.f32 %v346_v23, %v347_v25 }
  0xb0   : > { %v342_v29 = vrot.slane %v341_v27, 1  ;;  %v349_v30 = vrot.slane %v348_v28, 1 }
  0xb2   : > { %v343_v32 = vmin.f32 %v341_v27, %v342_v29  ;;  %v350_v33 = vmin.f32 %v348_v28, %v349_v30 }
  0xb4   : > { %vm354_vm1 = vcmp.eq.f32.partialorder %v309_v13, %v343_v32  ;;  %vm356_vm2 = vcmp.eq.f32.partialorder %v312_v15, %v343_v32  ;;  %vm355_vm3 = vcmp.eq.f32.partialorder %v332_v14, %v350_v33  ;;  %vm357_vm4 = vcmp.eq.f32.partialorder %v335_v16, %v350_v33 }
  0xb5   : > { %v358_v34 = vsel %vm354_vm1, %v352_v26, 16  ;;  %v360_v35 = vsel %vm356_vm2, %v353_v31, 16  ;;  %v359_v36 = vsel %vm355_vm3, %v352_v26, 16  ;;  %v361_v37 = vsel %vm357_vm4, %v353_v31, 16 }
  0xb6   : > { %vm362_vm5 = vcmp.lt.s32.totalorder %v358_v34, %v360_v35  ;;  %vm373_vm6 = vcmp.lt.s32.totalorder %v359_v36, %v361_v37  ;;  %vm400_vm1 = vcmask 130048  }
  0xb7   : > { %v363_v38 = vsel %vm362_vm5, %v358_v34, %v360_v35  ;;  %v374_v39 = vsel %vm373_vm6, %v359_v36, %v361_v37 }
  0xb8   : > { %v364_v40 = vrot.slane %v363_v38, 4  ;;  %v375_v41 = vrot.slane %v374_v39, 4 }
  0xba   : > { %vm365_vm7 = vcmp.lt.s32.totalorder %v363_v38, %v364_v40  ;;  %vm376_vm8 = vcmp.lt.s32.totalorder %v374_v39, %v375_v41 }
  0xbb   : > { %v366_v42 = vsel %vm365_vm7, %v363_v38, %v364_v40  ;;  %v377_v43 = vsel %vm376_vm8, %v374_v39, %v375_v41 }
  0xbc   : > { %v367_v44 = vrot.slane %v366_v42, 2  ;;  %v378_v45 = vrot.slane %v377_v43, 2 }
  0xbe   : > { %vm368_vm9 = vcmp.lt.s32.totalorder %v366_v42, %v367_v44  ;;  %vm379_vm10 = vcmp.lt.s32.totalorder %v377_v43, %v378_v45 }
  0xbf   : > { %v369_v46 = vsel %vm368_vm9, %v366_v42, %v367_v44  ;;  %v380_v47 = vsel %vm379_vm10, %v377_v43, %v378_v45 }
  0xc0   : > { %v370_v48 = vrot.slane %v369_v46, 1  ;;  %v381_v49 = vrot.slane %v380_v47, 1 }
  0xc2   : > { %vm371_vm11 = vcmp.lt.s32.totalorder %v369_v46, %v370_v48  ;;  %vm382_vm12 = vcmp.lt.s32.totalorder %v380_v47, %v381_v49 }
  0xc3   : > { %v372_v50 = vsel %vm371_vm11, %v369_v46, %v370_v48  ;;  %v383_v51 = vsel %vm382_vm12, %v380_v47, %v381_v49 }
  0xc4   : > { %vm384_vm13 = vcmp.lt.s32.totalorder %v372_v50, 15  ;;  %vm386_vm14 = vcmp.lt.s32.totalorder %v383_v51, 15 }
  0xc5   : > { %v385_v52 = vsel %vm384_vm13, %v372_v50, 15  ;;  %v387_v53 = vsel %vm386_vm14, %v383_v51, 15 }
  0xc6   : > { %vm390_vm15 = vcmp.eq.s32.totalorder %v353_v31, %v385_v52  ;;  %vm391_vm0 = vcmp.eq.s32.totalorder %v353_v31, %v387_v53  ;;  %vm388_vm2 = vcmp.eq.s32.totalorder %v352_v26, %v385_v52  ;;  %vm389_vm3 = vcmp.eq.s32.totalorder %v352_v26, %v387_v53 }
  0xc7   : > { %618 = vmatpush.msk.msra.mxu2 %vm390_vm15, %v809_v54  ;;  %621 = vmatpush.msk.msra.mxu3 %vm391_vm0, %v809_v54 }
  0xc9   : > { %619 = vmatpush.msk.msra.mxu2 %vm388_vm2, %v809_v54  ;;  %622 = vmatpush.msk.msra.mxu3 %vm389_vm3, %v809_v54 }
  0xca   : > { %620 = vmatmul.msk.f32.vlgmr.msra.gmra.mxu2 %vm400_vm1, %v271_v55  ;;  %623 = vmatmul.msk.f32.vlgmr.msra.gmra.mxu3 %vm400_vm1, %v271_v55 }
 0x14d   : > { %v421_v56 = vpop.f32.mrf.mxu2  ;;  %v441_v57 = vpop.f32.mrf.mxu3 }
 0x14e   : > { %444 = vst [vmem:[%s248_s13] sm:$0xff] %v421_v56  ;;  %v446_v58 = vsub.f32 %v421_v56, %v906_v3  ;;  %v447_v59 = vsub.f32 %v441_v57, %v908_v4 }
 0x14f   : > { %445 = vst [vmem:[%s248_s13 + $0x8] sm:$0xff] %v441_v57 }
 0x150   : > { %v448_v60 = vmul.f32 %v446_v58, %v446_v58  ;;  %v449_v61 = vmul.f32 %v447_v59, %v447_v59 }
 0x151   : > { %723 = shalt.err (!%p720_p5)
}
 0x152   : > { %633 = dma.vmem_to_hbm [thread:$0]  (%p880_p4), %s474_s14, 256, %s476_s17, %s453_s9   ;;  %v450_v62 = vadd.f32 %v449_v61, %v448_v60 }
 0x153   : > { %s458_s13 = scalar_lea.sflag [#allocation5], %s922_s7  ;;  %s738_s15 = sshra.s32 %s491_s8, 4  ;;  %s739_s15 = int_to_ptr.hbm [resolvable:$true] %s738_s15 }
 0x154   : > { %451 = vst [vmem:[%s255_s21] sm:$0xff] %v450_v62  ;;  %s740_s27 = scalar_lea.hbm %s739_s15, 8  ;;  %s744_s11 = scalar_lea.hbm %s988_s5, 16 }
 0x155   : > { %p741_p6 = scmp.ne.s32.totalorder %s739_s15, %s740_s27  ;;  %p745_p10 = scmp.lt.s32.totalorder %s739_s15, %s988_s5 }
 0x156   : > { %p746_p11 = scmp.lt.s32.totalorder %s744_s11, %s740_s27 }
 0x157   : > { %p742_p7 = pnand %p741_p6, %p880_p4 }
 0x158   : > { %p747_p12 = por %p746_p11, %p745_p10 }
 0x159   : > { %p743_p9 = pneg %p742_p7 }
 0x15b   : > { %p748_p13 = pnand %p747_p12, %p743_p9 }
 0x15d   : > { %751 = shalt.err (!%p748_p13)
}
 0x15e   : > { %634 = dma.vmem_to_hbm [thread:$0]  (%p880_p4), %s489_s29, 128, %s491_s8, %s458_s13  }
 0x15f PF: > { %p644_p0 = scmp.ge.s32.totalorder %s806_s23, 2  ;;  %s502_s7 = sand.u32 1, %s786_s18  }
 0x160   : > { %s503_s14 = scalar_lea.sflag [#allocation3], %s502_s7 }
 0x161   : > { %p638_p1 = pnand %p644_p0, %p887_p8 }
 0x163   : > { %p639_p2 = pneg %p638_p1 }
 0x165   : > { %777 = dma.done.wait (%p639_p2), %s503_s14, 256  }
 0x166   : > { %779 = vsyncadd (%p639_p2), %s503_s14, 4294967040  ;;  %s513_s17 = scalar_lea.sflag [#allocation5], %s502_s7 }
 0x167   : > { %781 = dma.done.wait (%p639_p2), %s513_s17, 128  }
 0x168   : > { %783 = vsyncadd (%p639_p2), %s513_s17, 4294967168  ;;  %s22_s23 = sadd.s32 1, %s806_s23   ;;  %s993_s18 = smov %s790_s19 }
 0x169   : > { %p19_p3 = scmp.ge.s32.totalorder %s22_s23, 4   ;;  %s994_s19 = smov %s794_s20 }
 0x16a   : > { %s995_s20 = smov %s893_s6  ;;  %s996_s21 = smov %s802_s22 }
 0x16b   : > { %s997_s22 = smov %s999_s26  ;;  %21 = sbr.rel (!%p19_p3) target bundleno = 8 (0x8), region = 88 }
 0x170   :  { %519 = vsyncpa [#allocation3], 1 }
 0x171   :  { %521 = vsyncpa [#allocation3 + $0x1], 1 }
 0x172   :  { %522 = vsyncpa [#allocation5], 1 }
 0x173   :  { %524 = vsyncpa [#allocation5 + $0x1], 1 }

</bundles_post_ra>
